<compile_context>
chip_gen: v7x
topology: tpu7x:2x2x1
jax: 0.10.0
libtpu: 0.0.40
codegen_flags: <defaults>
</compile_context>

<pallas_src>
import jax
import jax.numpy as jnp
from jax.experimental import pallas as pl
from jax.experimental.pallas import tpu as pltpu

_LANE = 128


def _round_up(n, m):
    return (n + m - 1) // m * m


def _mlp2_kernel(x_ref, w1_ref, b1_ref, w2_ref, b2_ref, latent_t_ref, logits_t_ref):
    """One batch tile.

    x_ref:        (TB, in_dim)      natural row-major batch tile
    w1_ref:       (latent, in_dim)  raw nn.Linear weight (no wrapper .T)
    b1_ref:       (latent, 1)       f32
    w2_ref:       (out, latent)     raw nn.Linear weight
    b2_ref:       (out, 1)          f32
    latent_t_ref: (latent, TB)      batch on the lane axis -> lane-dense stores
    logits_t_ref: (out, TB)
    """
    x = x_ref[...]

    # h^T = W1 . x^T : contract the in_dim axis of both operands directly;
    # the MXU handles the rhs transpose, so no transposed copy of x or W1.
    h_t = jax.lax.dot_general(
        w1_ref[...], x,
        dimension_numbers=(((1,), (1,)), ((), ())),
        preferred_element_type=jnp.float32,
    )                                             # (latent, TB) f32
    h_t = h_t + b1_ref[...]                       # (latent, 1) broadcasts over lanes

    # sigmoid(h) = 0.5 * (tanh(0.5*h) + 1): one EUP op, no exp + reciprocal.
    lat_t = 0.5 * (jnp.tanh(0.5 * h_t) + 1.0)     # (latent, TB) f32
    latent_t_ref[...] = lat_t.astype(latent_t_ref.dtype)

    # logits^T = W2 . latent^T.  K = latent_dim is tiny so the MXU is barely
    # used, but this kernel is DMA/overhead bound; one dot is the simplest
    # correct form.
    logits_t = jax.lax.dot_general(
        w2_ref[...], lat_t.astype(w2_ref.dtype),
        dimension_numbers=(((1,), (0,)), ((), ())),
        preferred_element_type=jnp.float32,
    )                                             # (out, TB) f32
    logits_t = logits_t + b2_ref[...]
    logits_t_ref[...] = logits_t.astype(logits_t_ref.dtype)


def mlp2_forward(x, w1, b1, w2, b2, *, block_b=512, input_dtype=None):
    """Forward pass of mlp2.

    x: (B, input_dim); w1: (latent, input); b1: (latent,);
    w2: (out, latent);  b2: (out,)          -- exactly the nn.Linear layout.

    Returns (latent, logits) with shapes (B, latent) / (B, out), matching the
    PyTorch module's outputs.
    """
    B, in_dim = x.shape
    latent_dim = w1.shape[0]
    out_dim = w2.shape[0]

    # Batch tile: >=128 so the lane axis of every output store is dense, and
    # a multiple of 128 so every grid step keeps full-width blocks.
    tb = max(_LANE, min(_round_up(block_b, _LANE), _round_up(B, _LANE)))
    b_pad = _round_up(B, tb)
    if b_pad != B:
        x = jnp.pad(x, ((0, b_pad - B), (0, 0)))

    # Optional bf16 storage / matmul-input dtype (accumulation stays f32).
    if input_dtype is not None:
        x = x.astype(input_dtype)
        w1 = w1.astype(input_dtype)
        w2 = w2.astype(input_dtype)

    # Biases as (feature, 1) columns so they broadcast along the lane (batch)
    # axis inside the kernel.
    b1c = b1.astype(jnp.float32).reshape(latent_dim, 1)
    b2c = b2.astype(jnp.float32).reshape(out_dim, 1)

    grid = (b_pad // tb,)
    latent_t, logits_t = pl.pallas_call(
        _mlp2_kernel,
        out_shape=(
            jax.ShapeDtypeStruct((latent_dim, b_pad), jnp.float32),
            jax.ShapeDtypeStruct((out_dim, b_pad), jnp.float32),
        ),
        grid=grid,
        in_specs=[
            pl.BlockSpec((tb, in_dim), lambda i: (i, 0)),           # x marches over batch
            pl.BlockSpec((latent_dim, in_dim), lambda i: (0, 0)),   # weights stay resident
            pl.BlockSpec((latent_dim, 1), lambda i: (0, 0)),
            pl.BlockSpec((out_dim, latent_dim), lambda i: (0, 0)),
            pl.BlockSpec((out_dim, 1), lambda i: (0, 0)),
        ],
        out_specs=(
            pl.BlockSpec((latent_dim, tb), lambda i: (0, i)),       # lane-dense stores
            pl.BlockSpec((out_dim, tb), lambda i: (0, i)),
        ),
        compiler_params=pltpu.CompilerParams(
            # Batch tiles are independent -> shard across both TCs on v7x.
            dimension_semantics=("parallel",),
        ),
    )(x, w1, b1c, w2, b2c)

    # Layout plumbing back to the nn.Module convention (batch-major).
    return latent_t[:, :B].T, logits_t[:, :B].T


def _init_params(key, input_dim=2, latent_dim=8, output_dim=2):
    # Deterministic synthetic params matching the nn.Linear shapes.
    k1, k2, k3, k4 = jax.random.split(key, 4)
    w1 = jax.random.normal(k1, (latent_dim, input_dim), jnp.float32) * 0.5
    b1 = jax.random.normal(k2, (latent_dim,), jnp.float32) * 0.1
    w2 = jax.random.normal(k3, (output_dim, latent_dim), jnp.float32) * 0.5
    b2 = jax.random.normal(k4, (output_dim,), jnp.float32) * 0.1
    return w1, b1, w2, b2


def _reference(x, w1, b1, w2, b2):
    lat = jax.nn.sigmoid(x @ w1.T + b1)
    return lat, lat @ w2.T + b2


if __name__ == "__main__":
    key = jax.random.PRNGKey(0)
    kx, kp = jax.random.split(key)

    input_dim, latent_dim, output_dim = 2, 8, 2
    w1, b1, w2, b2 = _init_params(kp, input_dim, latent_dim, output_dim)

    # B=200 with 128-row tiles: exercises the padding path (pad to 256) and a
    # 2-step batch grid with resident weights and double-buffered x tiles.
    B = 200
    x = jax.random.normal(kx, (B, input_dim), jnp.float32)

    latent, logits = mlp2_forward(x, w1, b1, w2, b2, block_b=128)
    jax.block_until_ready((latent, logits))

    lat_ref, log_ref = _reference(x, w1, b1, w2, b2)
    assert latent.shape == (B, latent_dim) and logits.shape == (B, output_dim)
    assert jnp.allclose(latent, lat_ref, atol=1e-4), "latent mismatch"
    assert jnp.allclose(logits, log_ref, atol=1e-4), "logits mismatch"

    print("KERNEL_OK")
</pallas_src>

<mosaic_0001>
module attributes {stable_mosaic.version = 11 : i64} {
  func.func @_mlp2_kernel(%arg0: i32, %arg1: memref<128x2xf32, #tpu.memory_space<vmem>>, %arg2: memref<8x2xf32, #tpu.memory_space<vmem>>, %arg3: memref<8x1xf32, #tpu.memory_space<vmem>>, %arg4: memref<2x8xf32, #tpu.memory_space<vmem>>, %arg5: memref<2x1xf32, #tpu.memory_space<vmem>>, %arg6: memref<8x128xf32, #tpu.memory_space<vmem>>, %arg7: memref<2x128xf32, #tpu.memory_space<vmem>>) attributes {dimension_semantics = [#tpu.dimension_semantics<parallel>], iteration_bounds = array<i64: 2>, scalar_prefetch = 0 : i64, scratch_operands = 0 : i64, tpu.core_type = #tpu.core_type<tc>, window_params = [{transform_indices = @transform_0, window_bounds = array<i64: 128, 2>}, {pipeline_mode = #tpu.pipeline_mode<synchronous>, transform_indices = @transform_1, window_bounds = array<i64: 8, 2>}, {pipeline_mode = #tpu.pipeline_mode<synchronous>, transform_indices = @transform_2, window_bounds = array<i64: 8, 1>}, {pipeline_mode = #tpu.pipeline_mode<synchronous>, transform_indices = @transform_3, window_bounds = array<i64: 2, 8>}, {pipeline_mode = #tpu.pipeline_mode<synchronous>, transform_indices = @transform_4, window_bounds = array<i64: 2, 1>}, {transform_indices = @transform_5, window_bounds = array<i64: 8, 128>}, {transform_indices = @transform_6, window_bounds = array<i64: 2, 128>}]} {
    %c0 = arith.constant 0 : index
    %c0_0 = arith.constant 0 : index
    %0 = vector.load %arg1[%c0, %c0_0] : memref<128x2xf32, #tpu.memory_space<vmem>>, vector<128x2xf32>
    %c0_1 = arith.constant 0 : index
    %c0_2 = arith.constant 0 : index
    %1 = vector.load %arg2[%c0_1, %c0_2] : memref<8x2xf32, #tpu.memory_space<vmem>>, vector<8x2xf32>
    %cst = arith.constant dense<0.000000e+00> : vector<8x128xf32>
    %2 = tpu.matmul %1, %0, %cst {dimension_numbers = #tpu.dot_dimension_numbers<[1], [1], [0], [0], [0, 0, 1, 0], [], []>} : vector<8x2xf32>, vector<128x2xf32>, vector<8x128xf32> -> vector<8x128xf32>
    %c0_3 = arith.constant 0 : index
    %c0_4 = arith.constant 0 : index
    %3 = vector.load %arg3[%c0_3, %c0_4] : memref<8x1xf32, #tpu.memory_space<vmem>>, vector<8x1xf32>
    %4 = vector.broadcast %3 : vector<8x1xf32> to vector<8x128xf32>
    %5 = arith.addf %2, %4 : vector<8x128xf32>
    %cst_5 = arith.constant 5.000000e-01 : f32
    %6 = vector.broadcast %cst_5 : f32 to vector<8x128xf32>
    %7 = arith.mulf %6, %5 : vector<8x128xf32>
    %8 = math.tanh %7 : vector<8x128xf32>
    %cst_6 = arith.constant 1.000000e+00 : f32
    %9 = vector.broadcast %cst_6 : f32 to vector<8x128xf32>
    %10 = arith.addf %8, %9 : vector<8x128xf32>
    %cst_7 = arith.constant 5.000000e-01 : f32
    %11 = vector.broadcast %cst_7 : f32 to vector<8x128xf32>
    %12 = arith.mulf %11, %10 : vector<8x128xf32>
    %c0_8 = arith.constant 0 : index
    %c0_9 = arith.constant 0 : index
    %13 = vector.load %arg6[%c0_8, %c0_9] : memref<8x128xf32, #tpu.memory_space<vmem>>, vector<8x128xf32>
    tpu.vector_store %arg6[%c0_8, %c0_9], %12 {strides = array<i32>} : memref<8x128xf32, #tpu.memory_space<vmem>>, vector<8x128xf32>,
    %c0_10 = arith.constant 0 : index
    %c0_11 = arith.constant 0 : index
    %14 = vector.load %arg4[%c0_10, %c0_11] : memref<2x8xf32, #tpu.memory_space<vmem>>, vector<2x8xf32>
    %cst_12 = arith.constant dense<0.000000e+00> : vector<2x128xf32>
    %15 = tpu.matmul %14, %12, %cst_12 {dimension_numbers = #tpu.dot_dimension_numbers<[1], [0], [0], [1], [0, 0, 1, 1], [], []>} : vector<2x8xf32>, vector<8x128xf32>, vector<2x128xf32> -> vector<2x128xf32>
    %c0_13 = arith.constant 0 : index
    %c0_14 = arith.constant 0 : index
    %16 = vector.load %arg5[%c0_13, %c0_14] : memref<2x1xf32, #tpu.memory_space<vmem>>, vector<2x1xf32>
    %17 = vector.broadcast %16 : vector<2x1xf32> to vector<2x128xf32>
    %18 = arith.addf %15, %17 : vector<2x128xf32>
    %c0_15 = arith.constant 0 : index
    %c0_16 = arith.constant 0 : index
    %19 = vector.load %arg7[%c0_15, %c0_16] : memref<2x128xf32, #tpu.memory_space<vmem>>, vector<2x128xf32>
    tpu.vector_store %arg7[%c0_15, %c0_16], %18 {strides = array<i32>} : memref<2x128xf32, #tpu.memory_space<vmem>>, vector<2x128xf32>,
    return
  }
  func.func @transform_0(%arg0: i32) -> (i32, i32) {
    %c0_i32 = arith.constant 0 : i32
    %c0_i32_0 = arith.constant 0 : i32
    return %arg0, %c0_i32 : i32, i32
  }
  func.func @transform_1(%arg0: i32) -> (i32, i32) {
    %c0_i32 = arith.constant 0 : i32
    %c0_i32_0 = arith.constant 0 : i32
    %c0_i32_1 = arith.constant 0 : i32
    return %c0_i32, %c0_i32_0 : i32, i32
  }
  func.func @transform_2(%arg0: i32) -> (i32, i32) {
    %c0_i32 = arith.constant 0 : i32
    %c0_i32_0 = arith.constant 0 : i32
    %c0_i32_1 = arith.constant 0 : i32
    return %c0_i32, %c0_i32_0 : i32, i32
  }
  func.func @transform_3(%arg0: i32) -> (i32, i32) {
    %c0_i32 = arith.constant 0 : i32
    %c0_i32_0 = arith.constant 0 : i32
    %c0_i32_1 = arith.constant 0 : i32
    return %c0_i32, %c0_i32_0 : i32, i32
  }
  func.func @transform_4(%arg0: i32) -> (i32, i32) {
    %c0_i32 = arith.constant 0 : i32
    %c0_i32_0 = arith.constant 0 : i32
    %c0_i32_1 = arith.constant 0 : i32
    return %c0_i32, %c0_i32_0 : i32, i32
  }
  func.func @transform_5(%arg0: i32) -> (i32, i32) {
    %c0_i32 = arith.constant 0 : i32
    %c0_i32_0 = arith.constant 0 : i32
    return %c0_i32, %arg0 : i32, i32
  }
  func.func @transform_6(%arg0: i32) -> (i32, i32) {
    %c0_i32 = arith.constant 0 : i32
    %c0_i32_0 = arith.constant 0 : i32
    return %c0_i32, %arg0 : i32, i32
  }
}

</mosaic_0001>

<bundles_post_ra>
// kernel: tpu_custom_call.1
= control target key start
LH: loop header
LB: loop body
LE: loop exit
PB: predicated region body
PF: predicated region fallthrough
CT: control target
= control target key end

     0   :  { %12 = vsyncpa [#allocation3], 0  ;;  %s1110_s0 = inlined_call_operand.vmem [shape: f32[256,2], index: 0, kind: input, shape index: {}]   ;;  %s1111_s1 = inlined_call_operand.vmem [shape: f32[8,2], index: 1, kind: input, shape index: {}]   ;;  %s1112_s2 = inlined_call_operand.vmem [shape: f32[8,1], index: 2, kind: input, shape index: {}]   ;;  %s1113_s3 = inlined_call_operand.vmem [shape: f32[2,8], index: 3, kind: input, shape index: {}]   ;;  %s1114_s4 = inlined_call_operand.vmem [shape: f32[2,1], index: 4, kind: input, shape index: {}]   ;;  %s1115_s5 = inlined_call_operand.hbm [shape: f32[8,256], index: 5, kind: output, shape index: {0}]   ;;  %s1116_s6 = inlined_call_operand.hbm [shape: f32[2,256], index: 6, kind: output, shape index: {1}]  }
   0x1   :  { %14 = vsyncpa [#allocation3 + $0x1], 0 }
   0x2   :  { %15 = vsyncpa [#allocation5], 0 }
   0x3   :  { %17 = vsyncpa [#allocation5 + $0x1], 0  ;;  %s929_s21 = smov 0   ;;  %s931_s22 = smov 0  }
   0x4   :  { %s933_s23 = smov 0   ;;  %s935_s24 = smov 0  }
   0x5 LB: > { %s950_s25 = sadd.s32 4294967295, %s886_s24   ;;  %s618_s26 = sadd.s32 4294967294, %s886_s24   ;;  %s886_s24 = sphi %s935_s24, %s1124_s24   ;;  %s882_s23 = sphi %s933_s23, %s1123_s23   ;;  %s878_s22 = sphi %s931_s22, %s1122_s22   ;;  %s874_s21 = sphi %s929_s21, %s1121_s21  }
   0x6   : > { %s954_s27 = sadd.s32 1, %s886_s24   ;;  %s140_s28 = sadd.s32 1, %s882_s23 }
   0x7   : > { %s137_s29 = ssub.s32 %s886_s24, %s954_s27  ;;  %p150_p0 = scmp.ne.s32.totalorder %s882_s23, %s878_s22 }
   0x8   : > { %p138_p1 = scmp.eq.s32.totalorder %s137_s29, 0  ;;  %p151_p2 = scmp.eq.s32.totalorder %s950_s25, 1 }
   0x9   : > { %p156_p3 = scmp.ne.s32.totalorder %s878_s22, %s874_s21  ;;  %p157_p4 = scmp.eq.s32.totalorder %s618_s26, 1 }
   0xa   : > { %s965_s30 = scalar_select %p138_p1, %s882_s23, %s140_s28  }
   0xb   : > { %p967_p5 = por %p151_p2, %p150_p0  ;;  %p971_p6 = por %p157_p4, %p156_p3 }
   0xc   : > { %p621_p7 = scmp.ge.s32.totalorder %s886_s24, 1  ;;  %p222_p8 = scmp.lt.s32.totalorder %s886_s24, 3 }
   0xe   : > { %p223_p9 = pnand %p621_p7, %p222_p8 }
   0xf   : > { %s624_s9 = sshll.u32 (!%p223_p9), %s950_s25, 4  ;;  %v888_v0 = vmov (!%p223_p9), 0.0|0.0   ;;  %vm889_vm0 = vmmov (!%p223_p9), 0   ;;  %v890_v1 = vmov (!%p223_p9), 0.0   ;;  %v280_v2 = vld [vmem:[%s1112_s2] sm:$0xff] (!%p223_p9)  ;;  %v891_v3 = vmov (!%p223_p9), 0  }
  0x10   : > { %226 = sbr.rel (%p223_p9) target bundleno = 552 (0x228), region = 40  ;;  %709 = vmatprep.subr.bf16.mxu0 (!%p223_p9), %v888_v0  ;;  %p258_p10 = scmp.lt.s32.totalorder (!%p223_p9), %s624_s9, 31  ;;  %701 = vmatprep.mubr.msk.f32.mxu0 (!%p223_p9), %vm889_vm0, %v890_v1  ;;  %vm286_vm1 = vcmask (!%p223_p9), 15360   ;;  %v414_v4 = vld [vmem:[%s1114_s4] sm:$0x3] (!%p223_p9)  ;;  %vm420_vm3 = vcmask (!%p223_p9), 64512  }
  0x11   : > { %789 = vset.pattern.permute.xlu0 (!%p223_p9), %v891_v3  ;;  %704 = vmatprep.subr.mxu1 (!%p223_p9), %v890_v1  ;;  %vm993_vm2 = vmpackc.low (!%p223_p9), %vm286_vm1, %vm286_vm1  ;;  %v279_v30 = vld [vmem:[%s1111_s1] sm:$0xff] (!%p223_p9)  ;;  %s1032_s20 = sand.u32 (!%p223_p9), 1, %s878_s22   ;;  %s646_s10 = sshll.u32 (!%p223_p9), %s950_s25, 7 }
  0x12   : > { %283 = vperm.xlu0 (!%p223_p9), %789, %v280_v2   ;;  %706 = vmatprep.mubr.msk.f32.mxu1 (!%p223_p9), %vm889_vm0, %v890_v1  ;;  %s622_s26 = sshll.u32 (!%p223_p9), %s1032_s20, 3  ;;  %v413_v39 = vld [vmem:[%s1113_s3] sm:$0x3] (!%p223_p9)  ;;  %s496_s15 = scalar_lea.sflag (!%p223_p9), [#allocation3], %s1032_s20 }
  0x16   : > { %417 = vperm.xlu0 (!%p223_p9), %789, %v414_v4  }
  0x17   : > { %s1126_s9 = smov (!%p258_p10, %s624_s9), 31 }
  0x18   : > { %s625_s14 = sshll.u32 %s1126_s9, 3  ;;  %s249_s9 = scalar_lea.vmem [#allocation2], %s622_s26 }
  0x19   : > { %s987_s17 = scalar_lea.vmem %s1110_s0, %s625_s14  ;;  %s514_s11 = sshll.u32 %s249_s9, 4  ;;  %s515_s11 = int_to_ptr.vmem [resolvable:$true] %s514_s11 }
  0x1a   : > { %v263_v5 = vld [vmem:[%s987_s17] sm:$0xff]  ;;  %v264_v6 = vld [vmem:[%s987_s17 + $0x8] sm:$0xff]  ;;  %v265_v9 = vld [vmem:[%s987_s17 + $0x10] sm:$0xff]  ;;  %s1042_s14 = scalar_lea.hbm %s1115_s5, %s646_s10  ;;  %s792_s16 = scalar_lea.vmem %s515_s11, 128 }
  0x1b   : > { %v710_v8 = vpack.c.bf16 %v264_v6, %v263_v5  ;;  %v266_v10 = vld [vmem:[%s987_s17 + $0x18] sm:$0xff]  ;;  %v267_v12 = vld [vmem:[%s987_s17 + $0x20] sm:$0xff]  ;;  %v268_v13 = vld [vmem:[%s987_s17 + $0x28] sm:$0xff]  ;;  %p793_p11 = scmp.ne.s32.totalorder %s515_s11, %s792_s16 }
  0x1c   : > { %v714_v11 = vpack.c.bf16 %v266_v10, %v265_v9  ;;  %v718_v14 = vpack.c.bf16 %v268_v13, %v267_v12  ;;  %v269_v15 = vld [vmem:[%s987_s17 + $0x30] sm:$0xff]  ;;  %v270_v16 = vld [vmem:[%s987_s17 + $0x38] sm:$0xff]  ;;  %v271_v18 = vld [vmem:[%s987_s17 + $0x40] sm:$0xff] }
  0x1d   : > { %712 = vmatpush3.bf16.xpose.msk.msra.mxu0 %vm993_vm2, %v710_v8  ;;  %v722_v17 = vpack.c.bf16 %v270_v16, %v269_v15  ;;  %v272_v19 = vld [vmem:[%s987_s17 + $0x48] sm:$0xff]  ;;  %v273_v21 = vld [vmem:[%s987_s17 + $0x50] sm:$0xff]  ;;  %v274_v22 = vld [vmem:[%s987_s17 + $0x58] sm:$0xff]  ;;  %p794_p12 = pnand %p793_p11, %p967_p5 }
  0x1e   : > { %713 = vmatprep.subr.bf16.mxu0 %v888_v0  ;;  %v726_v20 = vpack.c.bf16 %v272_v19, %v271_v18  ;;  %v730_v23 = vpack.c.bf16 %v274_v22, %v273_v21  ;;  %v275_v24 = vld [vmem:[%s987_s17 + $0x60] sm:$0xff]  ;;  %v276_v25 = vld [vmem:[%s987_s17 + $0x68] sm:$0xff]  ;;  %v277_v27 = vld [vmem:[%s987_s17 + $0x70] sm:$0xff] }
  0x1f   : > { %v734_v26 = vpack.c.bf16 %v276_v25, %v275_v24  ;;  %v278_v28 = vld [vmem:[%s987_s17 + $0x78] sm:$0xff]  ;;  %p795_p13 = pneg %p794_p12  ;;  %s892_s17 = smov [#allocation2]  }
  0x20   : > { %v738_v29 = vpack.c.bf16 %v278_v28, %v277_v27  ;;  %s796_s18 = sshll.u32 %s892_s17, 4  ;;  %s797_s18 = int_to_ptr.vmem [resolvable:$false] %s796_s18 }
  0x21   : > { %s798_s19 = scalar_lea.vmem %s797_s18, 256  ;;  %p799_p0 = scmp.lt.s32.totalorder %s515_s11, %s797_s18 }
  0x22   : > { %p800_p1 = scmp.lt.s32.totalorder %s798_s19, %s792_s16 }
  0x24   : > { %p801_p2 = por %p800_p1, %p799_p0 }
  0x25   : > { %716 = vmatpush3.bf16.xpose.msk.msra.mxu0 %vm993_vm2, %v714_v11 }
  0x26   : > { %717 = vmatprep.subr.bf16.mxu0 %v888_v0  ;;  %p802_p3 = pnand %p801_p2, %p795_p13 }
  0x2d   : > { %720 = vmatpush3.bf16.xpose.msk.msra.mxu0 %vm993_vm2, %v718_v14 }
  0x2e   : > { %721 = vmatprep.subr.bf16.mxu0 %v888_v0 }
  0x35   : > { %724 = vmatpush3.bf16.xpose.msk.msra.mxu0 %vm993_vm2, %v722_v17 }
  0x36   : > { %725 = vmatprep.subr.bf16.mxu0 %v888_v0 }
  0x3d   : > { %728 = vmatpush3.bf16.xpose.msk.msra.mxu0 %vm993_vm2, %v726_v20 }
  0x3e   : > { %729 = vmatprep.subr.bf16.mxu0 %v888_v0 }
  0x45   : > { %732 = vmatpush3.bf16.xpose.msk.msra.mxu0 %vm993_vm2, %v730_v23 }
  0x46   : > { %733 = vmatprep.subr.bf16.mxu0 %v888_v0 }
  0x4d   : > { %736 = vmatpush3.bf16.xpose.msk.msra.mxu0 %vm993_vm2, %v734_v26 }
  0x4e   : > { %737 = vmatprep.subr.bf16.mxu0 %v888_v0 }
  0x55   : > { %740 = vmatpush3.bf16.xpose.msk.msra.mxu0 %vm993_vm2, %v738_v29 }
  0x5c   : > { %702 = vmatmul.mubr.msk.f32.vlgmr.msra.gmra.mrb[0].mxu0 %vm286_vm1, %v279_v30 }
  0x91   : > { %v284_v31 = vpop.permute.xlu0 %283 }
 0x12f   : > { %v404_v32 = vpop.f32.mrb[0].mxu0 }
 0x130   : > { %v405_v33 = vadd.f32 %v404_v32, %v284_v31  ;;  %v703_v34 = vpop.f32.mrb[1].mxu0 }
 0x132   : > { %v408_v35 = vmul.f32 0.5, %v405_v33 }
 0x134   : > { %790 = vtanh.f32 %v408_v35 }
 0x13e   : > { %v791_v36 = vpop.eup %790 }
 0x13f   : > { %v410_v37 = vadd.f32 1.0, %v791_v36 }
 0x141   : > { %v411_v38 = vmul.f32 0.5, %v410_v37 }
 0x143   : > { %705 = vmatpush3.msra.mxu1 %v411_v38  ;;  %412 = vst [vmem:[%s249_s9] sm:$0xff] %v411_v38 }
 0x144   : > { %707 = vmatmul.mubr.msk.f32.vlgmr.msra.gmra.mrb[0].mxu1 %vm420_vm3, %v413_v39 }
 0x145   : > { %805 = shalt.err (!%p802_p3)
}
 0x146   : > { %s806_s26 = scalar_lea.hbm %s1042_s14, 128  ;;  %s810_s9 = scalar_lea.hbm %s1115_s5, 256 }
 0x147   : > { %p807_p4 = scmp.ne.s32.totalorder %s1042_s14, %s806_s26  ;;  %p811_p9 = scmp.lt.u32.totalorder %s1042_s14, %s1115_s5 }
 0x148   : > { %p812_p10 = scmp.lt.u32.totalorder %s810_s9, %s806_s26  ;;  %p814_p12 = scmp.lt.u32.totalorder %s806_s26, %s1042_s14 }
 0x149   : > { %p808_p7 = pnand %p807_p4, %p967_p5 }
 0x14a   : > { %p813_p11 = por %p812_p10, %p811_p9 }
 0x14b   : > { %p809_p8 = pneg %p808_p7 }
 0x14c   : > { %p815_p13 = por %p814_p12, %p813_p11 }
 0x14e   : > { %p816_p0 = pnand %p815_p13, %p809_p8 }
 0x150   : > { %819 = shalt.err (!%p816_p0)
}
 0x151   : > { %741 = dma.vmem_to_hbm [thread:$0]  (%p967_p5), %s515_s11, 128, %s1042_s14, %s496_s15   ;;  %v418_v40 = vpop.permute.xlu0 %417 }
 0x152   : > { %s623_s13 = sshll.u32 %s1032_s20, 1  ;;  %s647_s16 = sshll.u32 %s950_s25, 5 }
 0x153   : > { %s256_s17 = scalar_lea.vmem [#allocation4], %s623_s13  ;;  %s1067_s28 = scalar_lea.hbm %s1116_s6, %s647_s16 }
 0x154   : > { %s527_s18 = sshll.u32 %s256_s17, 4  ;;  %s501_s11 = scalar_lea.sflag [#allocation5], %s1032_s20  ;;  %s1069_s18 = int_to_ptr.vmem [resolvable:$true] %s527_s18 }
 0x155   : > { %s820_s14 = scalar_lea.vmem %s1069_s18, 32  ;;  %s893_s25 = smov [#allocation4]  }
 0x156   : > { %p821_p1 = scmp.ne.s32.totalorder %s1069_s18, %s820_s14  ;;  %s824_s15 = sshll.u32 %s893_s25, 4  ;;  %s825_s15 = int_to_ptr.vmem [resolvable:$false] %s824_s15 }
 0x157   : > { %s826_s29 = scalar_lea.vmem %s825_s15, 64  ;;  %p827_p4 = scmp.lt.s32.totalorder %s1069_s18, %s825_s15 }
 0x158   : > { %p822_p2 = pnand %p821_p1, %p967_p5  ;;  %p828_p7 = scmp.lt.s32.totalorder %s826_s29, %s820_s14 }
 0x15a   : > { %p823_p3 = pneg %p822_p2  ;;  %p829_p8 = por %p828_p7, %p827_p4 }
 0x15c   : > { %p830_p9 = pnand %p829_p8, %p823_p3 }
 0x217   : > { %v490_v41 = vpop.f32.mrb[0].mxu1 }
 0x218   : > { %v491_v42 = vadd.f32 %v490_v41, %v418_v40  ;;  %v708_v43 = vpop.f32.mrb[1].mxu1 }
 0x21a   : > { %494 = vst [vmem:[%s256_s17] sm:$0x3] %v491_v42 }
 0x21b   : > { %833 = shalt.err (!%p830_p9)
}
 0x21c   : > { %s834_s20 = scalar_lea.hbm %s1067_s28, 32  ;;  %s838_s12 = scalar_lea.hbm %s1116_s6, 64 }
 0x21d   : > { %p835_p10 = scmp.ne.s32.totalorder %s1067_s28, %s834_s20  ;;  %p839_p13 = scmp.lt.u32.totalorder %s1067_s28, %s1116_s6 }
 0x21e   : > { %p840_p0 = scmp.lt.u32.totalorder %s838_s12, %s834_s20  ;;  %p842_p2 = scmp.lt.u32.totalorder %s834_s20, %s1067_s28 }
 0x21f   : > { %p836_p11 = pnand %p835_p10, %p967_p5 }
 0x220   : > { %p841_p1 = por %p840_p0, %p839_p13 }
 0x221   : > { %p837_p12 = pneg %p836_p11 }
 0x222   : > { %p843_p3 = por %p842_p2, %p841_p1 }
 0x224   : > { %p844_p4 = pnand %p843_p3, %p837_p12 }
 0x226   : > { %847 = shalt.err (!%p844_p4)
}
 0x227   : > { %742 = dma.vmem_to_hbm [thread:$0]  (%p967_p5), %s1069_s18, 32, %s1067_s28, %s501_s11  }
 0x228 PF: > { %p752_p7 = scmp.ge.s32.totalorder %s886_s24, 2  ;;  %s539_s17 = sand.u32 1, %s874_s21  }
 0x229   : > { %s540_s19 = scalar_lea.sflag [#allocation3], %s539_s17 }
 0x22a   : > { %p746_p8 = pnand %p752_p7, %p971_p6 }
 0x22c   : > { %865 = dma.done.wait (!%p746_p8), %s540_s19, 128  }
 0x22d   : > { %867 = vsyncadd (!%p746_p8), %s540_s19, 4294967168  ;;  %s549_s26 = scalar_lea.sflag [#allocation5], %s539_s17 }
 0x22e   : > { %869 = dma.done.wait (!%p746_p8), %s549_s26, 32  }
 0x22f   : > { %871 = vsyncadd (!%p746_p8), %s549_s26, 4294967264  ;;  %p20_p5 = scmp.ge.s32.totalorder %s954_s27, 4   ;;  %s1121_s21 = smov %s878_s22 }
 0x230   : > { %s1122_s22 = smov %s882_s23  ;;  %s1123_s23 = smov %s965_s30 }
 0x231   : > { %s1124_s24 = smov %s954_s27  ;;  %22 = sbr.rel (!%p20_p5) target bundleno = 5 (0x5), region = 92 }
 0x238   :  { %554 = vsyncpa [#allocation3], 1 }
 0x239   :  { %556 = vsyncpa [#allocation3 + $0x1], 1 }
 0x23a   :  { %557 = vsyncpa [#allocation5], 1 }
 0x23b   :  { %559 = vsyncpa [#allocation5 + $0x1], 1 }

</bundles_post_ra>
